<compile_context>
chip_gen: v7x
topology: tpu7x:2x2x1
jax: 0.10.0
libtpu: 0.0.40
codegen_flags: <defaults>
</compile_context>

<pallas_src>
import jax
import jax.numpy as jnp
from jax.experimental import pallas as pl
from jax.experimental.pallas import tpu as pltpu

LANES = 128              # vreg lane width
C_PAD = 16               # classes padded to 16 (power of two, divides 128)
PACK = LANES // C_PAD    # 8 batch rows packed per 128-lane output row


def _round_up(n, m):
    return ((n + m - 1) // m) * m


def _cdiv(a, b):
    return -(-a // b)


def mlp_kernel(x_ref, w1_ref, b1_ref, w2_ref, b2_ref, mask_ref, o_ref):
    # fc1: [TB, dx](bf16) @ [dx, H](bf16) -> f32 accum; bias + ReLU in f32.
    h = jnp.dot(x_ref[...], w1_ref[...], preferred_element_type=jnp.float32)
    h = jnp.maximum(h + b1_ref[...], 0.0)
    # TODO(synk): optionally chunk fc1->ReLU->fc5 over 256-row sub-tiles
    # (lax.fori_loop unroll=True) to cut vreg pressure on the h intermediate.

    # fc5 against the lane-tiled weights: [TB, H] @ [H, 128] -> [TB, 128] f32.
    # Column block s of w2/b2 is a copy of the (padded) class weights, so
    # z[t, s*16 + c] == logits(batch row t, class c) for every s.
    z = jnp.dot(h.astype(w2_ref.dtype), w2_ref[...],
                preferred_element_type=jnp.float32) + b2_ref[...]

    # Pack PACK(=8) batch rows into one 128-lane output row:
    #   out[r, s*16 + c] = z[8r + s, s*16 + c]
    # The reshape keeps the lane dim (128) intact (layout-preserving); the
    # one-hot mask selects lane group s for sublane s; the sublane reduce
    # collapses the 8 rows into one dense 128-lane row.
    tb = z.shape[0]
    zg = z.reshape(tb // PACK, PACK, LANES) * mask_ref[...]
    zsel = zg.sum(axis=1)                                    # [tb//8, 128]

    # sigmoid(z) = 1 / (1 + exp(-z)); exp and reciprocal both go to the EUP.
    o_ref[...] = pl.reciprocal(1.0 + jnp.exp(-zsel), approx=True).astype(o_ref.dtype)


def mlp_forward(x, w1, b1, w2, b2, *, tb_max=2048):
    """x: [B, dx] f32; w1: [dx, hidden]; b1: [hidden]; w2: [hidden, C]; b2: [C]."""
    B, dx = x.shape
    hidden = w1.shape[1]
    num_classes = w2.shape[1]
    assert num_classes <= C_PAD, "lane-dense packing assumes <= 16 classes"
    # TODO(synk): for num_classes > 16, fall back to an unpacked (TB, C) output.

    # --- Lane-dense hidden dim: zero-pad hidden -> 128 (no effect on math). ---
    H = _round_up(max(hidden, LANES), LANES)
    w1p = jnp.pad(w1, ((0, 0), (0, H - hidden)))
    b1p = jnp.pad(b1, (0, H - hidden))
    w2p = jnp.pad(w2, ((0, H - hidden), (0, C_PAD - num_classes)))   # [H, 16]
    b2p = jnp.pad(b2, (0, C_PAD - num_classes))                      # [16]

    # Tile the class axis 8x so column block s repeats the class weights.
    w2_dense = jnp.tile(w2p, (1, PACK))                     # [H, 128]
    b2_dense = jnp.tile(b2p, PACK).reshape(1, LANES)        # [1, 128], f32
    b1_2d = b1p.reshape(1, H)                               # [1, H],   f32

    # One-hot lane-group mask: mask[s, lane] = (lane // 16 == s).
    mask = (jnp.arange(LANES)[None, :] // C_PAD
            == jnp.arange(PACK)[:, None]).astype(jnp.float32)

    # --- bf16 streaming of the big operands (f32 accumulation in-kernel). ---
    x_bf = x.astype(jnp.bfloat16)
    w1_bf = w1p.astype(jnp.bfloat16)
    w2_bf = w2_dense.astype(jnp.bfloat16)

    # --- Batch tiling: TB multiple of 64 so the packed output block
    # (TB//8, 128) stays (8,128)-aligned; force >=2 (and even) grid steps when
    # the batch allows it so v7x's two TensorCores get balanced work. ---
    ALIGN = 8 * PACK                      # 64
    B_al = _round_up(B, ALIGN)
    n_steps = max(1, _cdiv(B_al, tb_max))
    if B_al >= 2 * ALIGN:
        n_steps = max(n_steps, 2)
        n_steps += n_steps % 2            # even step count -> balanced on v7x
    TB = _round_up(_cdiv(B_al, n_steps), ALIGN)
    B_pad = TB * n_steps
    if B_pad != B:
        x_bf = jnp.pad(x_bf, ((0, B_pad - B), (0, 0)))
    grid = (n_steps,)

    # Per-tile VMEM (TB=2048): x bf16 128 KiB + packed f32 out 128 KiB, each
    # double-buffered, plus ~80 KiB of resident weights/biases/mask -> well
    # under the limit below on every generation (v7x physical VMEM = 64 MiB).
    out_packed = pl.pallas_call(
        mlp_kernel,
        out_shape=jax.ShapeDtypeStruct((B_pad // PACK, LANES), jnp.float32),
        grid=grid,
        in_specs=[
            pl.BlockSpec((TB, dx), lambda i: (i, 0)),        # x: streamed per tile
            pl.BlockSpec((dx, H), lambda i: (0, 0)),         # w1: VMEM-resident
            pl.BlockSpec((1, H), lambda i: (0, 0)),          # b1: VMEM-resident
            pl.BlockSpec((H, LANES), lambda i: (0, 0)),      # w2 (lane-tiled)
            pl.BlockSpec((1, LANES), lambda i: (0, 0)),      # b2 (lane-tiled)
            pl.BlockSpec((PACK, LANES), lambda i: (0, 0)),   # lane-group mask
        ],
        out_specs=pl.BlockSpec((TB // PACK, LANES), lambda i: (i, 0)),
        compiler_params=pltpu.CompilerParams(
            dimension_semantics=("parallel",),
            vmem_limit_bytes=32 * 1024 * 1024),
    )(x_bf, w1_bf, b1_2d, w2_bf, b2_dense, mask)

    # Unpack: (B_pad//8, 128) -> (B_pad, 16) is a contiguous row-major reshape.
    out = out_packed.reshape(B_pad, C_PAD)
    return out[:B, :num_classes]


def init_params(key, dx, hidden, num_classes):
    """Deterministic init matching nn.Linear's U(-1/sqrt(fan_in), 1/sqrt(fan_in))."""
    k1, k2, k3, k4 = jax.random.split(key, 4)
    bound1 = 1.0 / jnp.sqrt(dx)
    bound2 = 1.0 / jnp.sqrt(hidden)
    # Stored as [in, out] (transposed relative to PyTorch's [out, in]).
    w1 = jax.random.uniform(k1, (dx, hidden), jnp.float32, -bound1, bound1)
    b1 = jax.random.uniform(k2, (hidden,), jnp.float32, -bound1, bound1)
    w2 = jax.random.uniform(k3, (hidden, num_classes), jnp.float32, -bound2, bound2)
    b2 = jax.random.uniform(k4, (num_classes,), jnp.float32, -bound2, bound2)
    return w1, b1, w2, b2


def _reference(x, w1, b1, w2, b2):
    return jax.nn.sigmoid(jnp.maximum(x @ w1 + b1, 0.0) @ w2 + b2)


if __name__ == "__main__":
    dx = 32
    hidden = 64          # fixed by the module (nn.Linear(dx, 64))
    num_classes = 10

    key = jax.random.PRNGKey(0)
    kx, kx2, kp = jax.random.split(key, 3)
    w1, b1, w2, b2 = init_params(kp, dx, hidden, num_classes)

    # --- Check 1: small batch, matching the module's x.view(-1, dx) glue. ---
    batch = 8
    x_raw = jax.random.normal(kx, (batch, 2, dx // 2), jnp.float32)
    x = x_raw.reshape(-1, dx)  # equivalent of x.view(-1, self.dx)

    out = mlp_forward(x, w1, b1, w2, b2)
    jax.block_until_ready(out)
    ref = _reference(x, w1, b1, w2, b2)
    assert out.shape == (batch, num_classes)
    # bf16 streaming + approx reciprocal -> loosened tolerance vs f32 reference.
    assert jnp.allclose(out, ref, atol=2e-2, rtol=2e-2), \
        float(jnp.max(jnp.abs(out - ref)))

    # --- Check 2: larger ragged batch exercising the 2-step (megacore) grid. ---
    batch2 = 2309  # not a multiple of the tile -> wrapper pads & slices back
    x2 = jax.random.normal(kx2, (batch2, dx), jnp.float32)
    out2 = mlp_forward(x2, w1, b1, w2, b2)
    jax.block_until_ready(out2)
    ref2 = _reference(x2, w1, b1, w2, b2)
    assert out2.shape == (batch2, num_classes)
    assert jnp.allclose(out2, ref2, atol=2e-2, rtol=2e-2), \
        float(jnp.max(jnp.abs(out2 - ref2)))

    print("KERNEL_OK")
</pallas_src>

<mosaic_0001>
module attributes {stable_mosaic.version = 11 : i64} {
  func.func @mlp_kernel(%arg0: i32, %arg1: memref<64x32xbf16, #tpu.memory_space<vmem>>, %arg2: memref<32x128xbf16, #tpu.memory_space<vmem>>, %arg3: memref<1x128xf32, #tpu.memory_space<vmem>>, %arg4: memref<128x128xbf16, #tpu.memory_space<vmem>>, %arg5: memref<1x128xf32, #tpu.memory_space<vmem>>, %arg6: memref<8x128xf32, #tpu.memory_space<vmem>>, %arg7: memref<8x128xf32, #tpu.memory_space<vmem>>) attributes {dimension_semantics = [#tpu.dimension_semantics<parallel>], iteration_bounds = array<i64: 1>, scalar_prefetch = 0 : i64, scratch_operands = 0 : i64, tpu.core_type = #tpu.core_type<tc>, window_params = [{transform_indices = @transform_0, window_bounds = array<i64: 64, 32>}, {pipeline_mode = #tpu.pipeline_mode<synchronous>, transform_indices = @transform_1, window_bounds = array<i64: 32, 128>}, {pipeline_mode = #tpu.pipeline_mode<synchronous>, transform_indices = @transform_2, window_bounds = array<i64: 1, 128>}, {pipeline_mode = #tpu.pipeline_mode<synchronous>, transform_indices = @transform_3, window_bounds = array<i64: 128, 128>}, {pipeline_mode = #tpu.pipeline_mode<synchronous>, transform_indices = @transform_4, window_bounds = array<i64: 1, 128>}, {pipeline_mode = #tpu.pipeline_mode<synchronous>, transform_indices = @transform_5, window_bounds = array<i64: 8, 128>}, {transform_indices = @transform_6, window_bounds = array<i64: 8, 128>}]} {
    %c0 = arith.constant 0 : index
    %c0_0 = arith.constant 0 : index
    %0 = vector.load %arg1[%c0, %c0_0] : memref<64x32xbf16, #tpu.memory_space<vmem>>, vector<64x32xbf16>
    %c0_1 = arith.constant 0 : index
    %c0_2 = arith.constant 0 : index
    %1 = vector.load %arg2[%c0_1, %c0_2] : memref<32x128xbf16, #tpu.memory_space<vmem>>, vector<32x128xbf16>
    %cst = arith.constant dense<0.000000e+00> : vector<64x128xf32>
    %2 = tpu.matmul %0, %1, %cst {dimension_numbers = #tpu.dot_dimension_numbers<[1], [0], [0], [1], [0, 0, 1, 1], [], []>} : vector<64x32xbf16>, vector<32x128xbf16>, vector<64x128xf32> -> vector<64x128xf32>
    %c0_3 = arith.constant 0 : index
    %c0_4 = arith.constant 0 : index
    %3 = vector.load %arg3[%c0_3, %c0_4] : memref<1x128xf32, #tpu.memory_space<vmem>>, vector<1x128xf32>
    %4 = vector.broadcast %3 : vector<1x128xf32> to vector<64x128xf32>
    %5 = arith.addf %2, %4 : vector<64x128xf32>
    %cst_5 = arith.constant 0.000000e+00 : f32
    %6 = vector.broadcast %cst_5 : f32 to vector<64x128xf32>
    %7 = arith.maximumf %5, %6 : vector<64x128xf32>
    %8 = arith.truncf %7 : vector<64x128xf32> to vector<64x128xbf16>
    %c0_6 = arith.constant 0 : index
    %c0_7 = arith.constant 0 : index
    %9 = vector.load %arg4[%c0_6, %c0_7] : memref<128x128xbf16, #tpu.memory_space<vmem>>, vector<128x128xbf16>
    %cst_8 = arith.constant dense<0.000000e+00> : vector<64x128xf32>
    %10 = tpu.matmul %8, %9, %cst_8 {dimension_numbers = #tpu.dot_dimension_numbers<[1], [0], [0], [1], [0, 0, 1, 1], [], []>} : vector<64x128xbf16>, vector<128x128xbf16>, vector<64x128xf32> -> vector<64x128xf32>
    %c0_9 = arith.constant 0 : index
    %c0_10 = arith.constant 0 : index
    %11 = vector.load %arg5[%c0_9, %c0_10] : memref<1x128xf32, #tpu.memory_space<vmem>>, vector<1x128xf32>
    %12 = vector.broadcast %11 : vector<1x128xf32> to vector<64x128xf32>
    %13 = arith.addf %10, %12 : vector<64x128xf32>
    %14 = vector.shape_cast %13 : vector<64x128xf32> to vector<8x8x128xf32>
    %c0_11 = arith.constant 0 : index
    %c0_12 = arith.constant 0 : index
    %15 = vector.load %arg6[%c0_11, %c0_12] : memref<8x128xf32, #tpu.memory_space<vmem>>, vector<8x128xf32>
    %16 = vector.shape_cast %15 : vector<8x128xf32> to vector<1x8x128xf32>
    %17 = vector.broadcast %16 : vector<1x8x128xf32> to vector<8x8x128xf32>
    %18 = arith.mulf %14, %17 : vector<8x8x128xf32>
    %cst_13 = arith.constant dense<0.000000e+00> : vector<8x128xf32>
    %19 = vector.multi_reduction <add>, %18, %cst_13 [1] : vector<8x8x128xf32> to vector<8x128xf32>
    %cst_14 = arith.constant 0.000000e+00 : f32
    %20 = vector.broadcast %cst_14 : f32 to vector<8x128xf32>
    %21 = arith.subf %20, %19 : vector<8x128xf32>
    %22 = math.exp %21 : vector<8x128xf32>
    %cst_15 = arith.constant 1.000000e+00 : f32
    %23 = vector.broadcast %cst_15 : f32 to vector<8x128xf32>
    %24 = arith.addf %23, %22 : vector<8x128xf32>
    %25 = tpu.reciprocal %24 {approx = true} : vector<8x128xf32> -> vector<8x128xf32>
    %c0_16 = arith.constant 0 : index
    %c0_17 = arith.constant 0 : index
    %26 = vector.load %arg7[%c0_16, %c0_17] : memref<8x128xf32, #tpu.memory_space<vmem>>, vector<8x128xf32>
    tpu.vector_store %arg7[%c0_16, %c0_17], %25 {strides = array<i32>} : memref<8x128xf32, #tpu.memory_space<vmem>>, vector<8x128xf32>,
    return
  }
  func.func @transform_0(%arg0: i32) -> (i32, i32) {
    %c0_i32 = arith.constant 0 : i32
    %c0_i32_0 = arith.constant 0 : i32
    return %arg0, %c0_i32 : i32, i32
  }
  func.func @transform_1(%arg0: i32) -> (i32, i32) {
    %c0_i32 = arith.constant 0 : i32
    %c0_i32_0 = arith.constant 0 : i32
    %c0_i32_1 = arith.constant 0 : i32
    return %c0_i32, %c0_i32_0 : i32, i32
  }
  func.func @transform_2(%arg0: i32) -> (i32, i32) {
    %c0_i32 = arith.constant 0 : i32
    %c0_i32_0 = arith.constant 0 : i32
    %c0_i32_1 = arith.constant 0 : i32
    return %c0_i32, %c0_i32_0 : i32, i32
  }
  func.func @transform_3(%arg0: i32) -> (i32, i32) {
    %c0_i32 = arith.constant 0 : i32
    %c0_i32_0 = arith.constant 0 : i32
    %c0_i32_1 = arith.constant 0 : i32
    return %c0_i32, %c0_i32_0 : i32, i32
  }
  func.func @transform_4(%arg0: i32) -> (i32, i32) {
    %c0_i32 = arith.constant 0 : i32
    %c0_i32_0 = arith.constant 0 : i32
    %c0_i32_1 = arith.constant 0 : i32
    return %c0_i32, %c0_i32_0 : i32, i32
  }
  func.func @transform_5(%arg0: i32) -> (i32, i32) {
    %c0_i32 = arith.constant 0 : i32
    %c0_i32_0 = arith.constant 0 : i32
    %c0_i32_1 = arith.constant 0 : i32
    return %c0_i32, %c0_i32_0 : i32, i32
  }
  func.func @transform_6(%arg0: i32) -> (i32, i32) {
    %c0_i32 = arith.constant 0 : i32
    %c0_i32_0 = arith.constant 0 : i32
    return %arg0, %c0_i32 : i32, i32
  }
}

</mosaic_0001>

<bundles_post_ra>
// kernel: tpu_custom_call.1
= control target key start
LH: loop header
LB: loop body
LE: loop exit
PB: predicated region body
PF: predicated region fallthrough
CT: control target
= control target key end

     0   :  { %11 = vsyncpa [#allocation3], 0  ;;  %s718_s0 = inlined_call_operand.vmem [shape: bf16[64,32], index: 0, kind: input, shape index: {}]   ;;  %s719_s1 = inlined_call_operand.vmem [shape: bf16[32,128], index: 1, kind: input, shape index: {}]   ;;  %s720_s2 = inlined_call_operand.vmem [shape: f32[1,128], index: 2, kind: input, shape index: {}]   ;;  %s721_s3 = inlined_call_operand.hbm [shape: bf16[128,128], index: 3, kind: input, shape index: {}]   ;;  %s722_s4 = inlined_call_operand.vmem [shape: f32[1,128], index: 4, kind: input, shape index: {}]   ;;  %s723_s5 = inlined_call_operand.vmem [shape: f32[8,128], index: 5, kind: input, shape index: {}]   ;;  %s724_s6 = inlined_call_operand.hbm [shape: f32[8,128], index: 6, kind: output, shape index: {}]  }
   0x1   :  { %12 = vsyncpa [#allocation4], 0  ;;  %s624_s21 = smov [#allocation2]   ;;  %s576_s25 = scalar_lea.hbm %s721_s3, 1024 }
   0x2   :  { %s24_s22 = sshll.u32 %s624_s21, 4  ;;  %p577_p0 = scmp.ne.s32.totalorder %s721_s3, %s576_s25  ;;  %s25_s22 = int_to_ptr.vmem [resolvable:$true] %s24_s22 }
   0x3   :  { %p580_p1 = scmp.lt.u32.totalorder %s576_s25, %s721_s3 }
   0x5   :  { %p582_p2 = pnand %p580_p1, %p577_p0 }
   0x7   :  { %585 = shalt.err (!%p582_p2)
}
   0x8   :  { %s586_s30 = scalar_lea.vmem %s25_s22, 1024  ;;  %p591_p4 = scmp.lt.s32.totalorder %s25_s22, %s25_s22 }
   0x9   :  { %p587_p3 = scmp.ne.s32.totalorder %s25_s22, %s586_s30  ;;  %p592_p5 = scmp.lt.s32.totalorder %s586_s30, %s586_s30 }
   0xb   :  { %p593_p6 = por %p592_p5, %p591_p4 }
   0xd   :  { %p594_p7 = pnand %p593_p6, %p587_p3 }
   0xf   :  { %597 = shalt.err (!%p594_p7)
}
  0x10   :  { %s625_s7 = smov 64   ;;  %s626_s8 = smov 4  }
  0x11   :  { %30 = dma.hbm_to_vmem [thread:$0]  %s721_s3, 1024, %s25_s22, [#allocation3], %s625_s7, %s625_s7, %s626_s8  }
  0x12   :  { %620 = dma.done.wait [#allocation3], 1024  }
  0x13   :  { %621 = vsyncadd [#allocation3], 4294966272  ;;  %v530_v0 = vld [vmem:[%s719_s1] sm:$0xff]   ;;  %v531_v1 = vld [vmem:[%s719_s1 + $0x8] sm:$0xff]   ;;  %vm90_vm0 = vcmask 261120   ;;  %vm421_vm1 = vcmask 1041409  }
  0x14   :  { %490 = vmatprep.subr.bf16.mxu0 %v530_v0  ;;  %v532_v2 = vld [vmem:[%s718_s0] sm:$0xff]   ;;  %v533_v3 = vld [vmem:[%s718_s0 + $0x8] sm:$0xff]   ;;  %v534_v4 = vld [vmem:[%s718_s0 + $0x10] sm:$0xff]   ;;  %vm423_vm2 = vcmask 1042434   ;;  %vm425_vm3 = vcmask 1043459   ;;  %vm427_vm4 = vcmask 1044484  }
  0x15   :  { %491 = vmatpush3.bf16.msra.mxu0 %v530_v0  ;;  %494 = vmatprep.mubr.msk.bf16.mxu0 %vm90_vm0, %v532_v2  ;;  %v536_v5 = vld [vmem:[#allocation2] sm:$0xff]   ;;  %v537_v6 = vld [vmem:[#allocation2 + $0x8] sm:$0xff]   ;;  %v538_v7 = vld [vmem:[#allocation2 + $0x10] sm:$0xff]   ;;  %vm429_vm5 = vcmask 1045509   ;;  %vm431_vm6 = vcmask 1046534   ;;  %vm433_vm7 = vcmask 1047559  }
  0x16   :  { %492 = vmatprep.subr.bf16.mxu0 %v531_v1  ;;  %502 = vmatprep.subr.bf16.mxu1 %v536_v5  ;;  %v535_v8 = vld [vmem:[%s718_s0 + $0x18] sm:$0xff]   ;;  %v540_v10 = vld [vmem:[#allocation2 + $0x20] sm:$0xff]   ;;  %v541_v11 = vld [vmem:[#allocation2 + $0x28] sm:$0xff]  }
  0x17   :  { %503 = vmatpush3.bf16.msra.mxu1 %v536_v5  ;;  %v539_v9 = vld [vmem:[#allocation2 + $0x18] sm:$0xff]   ;;  %v542_v12 = vld [vmem:[#allocation2 + $0x30] sm:$0xff]   ;;  %v452_v14 = vld [vmem:[%s720_s2] ss:$0 sm:$0xff] }
  0x18   :  { %504 = vmatprep.subr.bf16.mxu1 %v537_v6  ;;  %v543_v13 = vld [vmem:[#allocation2 + $0x38] sm:$0xff]   ;;  %v463_v43 = vld [vmem:[%s722_s4] ss:$0 sm:$0xff]  ;;  %s627_s4 = smov [#allocation5]  }
  0x19   :  { %493 = vmatpush3.bf16.msra.mxu0 %v531_v1  ;;  %v316_v45 = vld [vmem:[%s723_s5] sm:$0xff]  ;;  %s443_s5 = sshll.u32 %s627_s4, 4  ;;  %s444_s5 = int_to_ptr.vmem [resolvable:$true] %s443_s5 }
  0x1a   :  { %s598_s25 = scalar_lea.vmem %s444_s5, 128  ;;  %p603_p9 = scmp.lt.s32.totalorder %s444_s5, %s444_s5 }
  0x1b   :  { %505 = vmatpush3.bf16.msra.mxu1 %v537_v6  ;;  %p599_p8 = scmp.ne.s32.totalorder %s444_s5, %s598_s25  ;;  %p604_p10 = scmp.lt.s32.totalorder %s598_s25, %s598_s25 }
  0x1c   :  { %495 = vmatmul.mubr.msk.bf16.vlgmr.msra.gmra.mrb[0].mxu0 %vm90_vm0, %v533_v3  ;;  %506 = vmatprep.subr.bf16.mxu1 %v538_v7 }
  0x1d   :  { %498 = vmatprep.mubr.msk.bf16.mxu0 %vm90_vm0, %v534_v4  ;;  %p605_p11 = por %p604_p10, %p603_p9 }
  0x1f   :  { %507 = vmatpush3.bf16.msra.mxu1 %v538_v7  ;;  %p606_p12 = pnand %p605_p11, %p599_p8 }
  0x20   :  { %508 = vmatprep.subr.bf16.mxu1 %v539_v9 }
  0x23   :  { %509 = vmatpush3.bf16.msra.mxu1 %v539_v9 }
  0x24   :  { %499 = vmatmul.mubr.msk.bf16.gmra.mrb[4].mxu0 %vm90_vm0, %v535_v8  ;;  %510 = vmatprep.subr.bf16.mxu1 %v540_v10 }
  0x27   :  { %511 = vmatpush3.bf16.msra.mxu1 %v540_v10 }
  0x28   :  { %512 = vmatprep.subr.bf16.mxu1 %v541_v11 }
  0x2b   :  { %513 = vmatpush3.bf16.msra.mxu1 %v541_v11 }
  0x2c   :  { %514 = vmatprep.subr.bf16.mxu1 %v542_v12 }
  0x2f   :  { %515 = vmatpush3.bf16.msra.mxu1 %v542_v12 }
  0x30   :  { %516 = vmatprep.subr.bf16.mxu1 %v543_v13 }
  0x33   :  { %517 = vmatpush3.bf16.msra.mxu1 %v543_v13 }
  0xef   :  { %v496_v15 = vpop.f32.mrb[0].mxu0 }
  0xf0   :  { %v146_v16 = vadd.f32 %v496_v15, %v452_v14  ;;  %v137_v17 = vpop.f32.mrb[1].mxu0 }
  0xf1   :  { %v138_v18 = vadd.f32 %v452_v14, %v137_v17  ;;  %v497_v19 = vpop.f32.mrb[2].mxu0 }
  0xf2   :  { %v149_v20 = vadd.f32 %v497_v19, %v452_v14  ;;  %v140_v21 = vpop.f32.mrb[3].mxu0  ;;  %v170_v23 = vmax.f32 %v146_v16, 0.0 }
  0xf3   :  { %v141_v22 = vadd.f32 %v452_v14, %v140_v21  ;;  %v168_v25 = vmax.f32 %v138_v18, 0.0 }
  0xf4   :  { %v171_v24 = vmax.f32 %v149_v20, 0.0 }
  0xf5   :  { %v169_v26 = vmax.f32 %v141_v22, 0.0 }
  0xf6   :  { %v177_v27 = vpack.c.bf16 %v171_v24, %v170_v23 }
  0xf7   :  { %v500_v28 = vpop.f32.mrb[4].mxu0  ;;  %v176_v29 = vpack.c.bf16 %v169_v26, %v168_v25 }
  0xf8   :  { %v162_v30 = vadd.f32 %v500_v28, %v452_v14  ;;  %v153_v31 = vpop.f32.mrb[5].mxu0 }
  0xf9   :  { %v154_v32 = vadd.f32 %v452_v14, %v153_v31  ;;  %v501_v33 = vpop.f32.mrb[6].mxu0  ;;  %518 = vmatprep.mubr.bf16.mxu1 %v176_v29 }
  0xfa   :  { %v165_v34 = vadd.f32 %v501_v33, %v452_v14  ;;  %v156_v35 = vpop.f32.mrb[7].mxu0  ;;  %519 = vmatmul.mubr.bf16.vlgmr.msra.gmra.mrb[0].mxu1 %v177_v27  ;;  %v174_v37 = vmax.f32 %v162_v30, 0.0 }
  0xfb   :  { %v157_v36 = vadd.f32 %v452_v14, %v156_v35  ;;  %v172_v39 = vmax.f32 %v154_v32, 0.0 }
  0xfc   :  { %v175_v38 = vmax.f32 %v165_v34, 0.0 }
  0xfd   :  { %v173_v40 = vmax.f32 %v157_v36, 0.0 }
  0xfe   :  { %v179_v41 = vpack.c.bf16 %v175_v38, %v174_v37 }
  0xff   :  { %v178_v42 = vpack.c.bf16 %v173_v40, %v172_v39 }
 0x101   :  { %522 = vmatprep.mubr.bf16.mxu1 %v178_v42 }
 0x102   :  { %523 = vmatmul.mubr.bf16.gmra.mrb[4].mxu1 %v179_v41 }
 0x1cd   :  { %v520_v44 = vpop.f32.mrb[0].mxu1 }
 0x1ce   :  { %v294_v46 = vadd.f32 %v520_v44, %v463_v43  ;;  %v285_v47 = vpop.f32.mrb[1].mxu1 }
 0x1cf   :  { %v286_v48 = vadd.f32 %v463_v43, %v285_v47  ;;  %v521_v49 = vpop.f32.mrb[2].mxu1 }
 0x1d0   :  { %v319_v50 = vmul.f32 %v316_v45, %v294_v46  ;;  %v297_v51 = vadd.f32 %v521_v49, %v463_v43  ;;  %v288_v52 = vpop.f32.mrb[3].mxu1 }
 0x1d1   :  { %v317_v53 = vmul.f32 %v316_v45, %v286_v48  ;;  %v289_v54 = vadd.f32 %v463_v43, %v288_v52 }
 0x1d2   :  { %v337_v55 = vrot.slane %v319_v50, 4  ;;  %v320_v56 = vmul.f32 %v316_v45, %v297_v51 }
 0x1d3   :  { %v325_v57 = vrot.slane %v317_v53, 4  ;;  %v318_v58 = vmul.f32 %v316_v45, %v289_v54 }
 0x1d4   :  { %v338_v59 = vadd.f32 %v337_v55, %v319_v50  ;;  %v343_v60 = vrot.slane %v320_v56, 4 }
 0x1d5   :  { %v326_v61 = vadd.f32 %v325_v57, %v317_v53  ;;  %v331_v62 = vrot.slane %v318_v58, 4  ;;  %v524_v63 = vpop.f32.mrb[4].mxu1 }
 0x1d6   :  { %v339_v0 = vrot.slane %v338_v59, 2  ;;  %v344_v1 = vadd.f32 %v343_v60, %v320_v56  ;;  %v310_v2 = vadd.f32 %v524_v63, %v463_v43  ;;  %v301_v3 = vpop.f32.mrb[5].mxu1 }
 0x1d7   :  { %v327_v4 = vrot.slane %v326_v61, 2  ;;  %v332_v5 = vadd.f32 %v331_v62, %v318_v58  ;;  %v302_v6 = vadd.f32 %v463_v43, %v301_v3  ;;  %v525_v7 = vpop.f32.mrb[6].mxu1 }
 0x1d8   :  { %v340_v8 = vadd.f32 %v339_v0, %v338_v59  ;;  %v345_v9 = vrot.slane %v344_v1, 2  ;;  %v323_v10 = vmul.f32 %v316_v45, %v310_v2  ;;  %v313_v11 = vadd.f32 %v525_v7, %v463_v43  ;;  %v304_v12 = vpop.f32.mrb[7].mxu1 }
 0x1d9   :  { %v328_v13 = vadd.f32 %v327_v4, %v326_v61  ;;  %v333_v14 = vrot.slane %v332_v5, 2  ;;  %v321_v15 = vmul.f32 %v316_v45, %v302_v6  ;;  %v305_v16 = vadd.f32 %v463_v43, %v304_v12 }
 0x1da   :  { %v341_v17 = vrot.slane %v340_v8, 1  ;;  %v346_v18 = vadd.f32 %v345_v9, %v344_v1  ;;  %v361_v19 = vrot.slane %v323_v10, 4  ;;  %v324_v20 = vmul.f32 %v316_v45, %v313_v11 }
 0x1db   :  { %v329_v21 = vrot.slane %v328_v13, 1  ;;  %v334_v22 = vadd.f32 %v333_v14, %v332_v5  ;;  %v349_v23 = vrot.slane %v321_v15, 4  ;;  %v322_v24 = vmul.f32 %v316_v45, %v305_v16 }
 0x1dc   :  { %v342_v25 = vadd.f32 %v341_v17, %v340_v8  ;;  %v347_v26 = vrot.slane %v346_v18, 1  ;;  %v362_v27 = vadd.f32 %v361_v19, %v323_v10  ;;  %v367_v28 = vrot.slane %v324_v20, 4 }
 0x1dd   :  { %v330_v29 = vadd.f32 %v329_v21, %v328_v13  ;;  %v335_v30 = vrot.slane %v334_v22, 1  ;;  %v350_v31 = vadd.f32 %v349_v23, %v321_v15  ;;  %v355_v32 = vrot.slane %v322_v24, 4 }
 0x1de   :  { %v375_v33 = vsub.f32 0.0, %v342_v25  ;;  %v348_v34 = vadd.f32 %v347_v26, %v346_v18  ;;  %v363_v35 = vrot.slane %v362_v27, 2  ;;  %v368_v36 = vadd.f32 %v367_v28, %v324_v20 }
 0x1df   :  { %v373_v37 = vsub.f32 0.0, %v330_v29  ;;  %v336_v38 = vadd.f32 %v335_v30, %v334_v22  ;;  %v351_v39 = vrot.slane %v350_v31, 2  ;;  %v356_v40 = vadd.f32 %v355_v32, %v322_v24 }
 0x1e0   :  { %v385_v41 = vmul.f32 1.442695, %v375_v33  ;;  %v376_v42 = vsub.f32 0.0, %v348_v34  ;;  %v364_v43 = vadd.f32 %v363_v35, %v362_v27  ;;  %v369_v44 = vrot.slane %v368_v36, 2 }
 0x1e1   :  { %v381_v45 = vmul.f32 1.442695, %v373_v37  ;;  %v374_v46 = vsub.f32 0.0, %v336_v38  ;;  %v352_v47 = vadd.f32 %v351_v39, %v350_v31  ;;  %v357_v48 = vrot.slane %v356_v40, 2 }
 0x1e2   :  { %544 = vpow2.f32 %v385_v41  ;;  %v387_v49 = vmul.f32 1.442695, %v376_v42  ;;  %v365_v50 = vrot.slane %v364_v43, 1  ;;  %v370_v51 = vadd.f32 %v369_v44, %v368_v36 }
 0x1e3   :  { %546 = vpow2.f32 %v381_v45  ;;  %v383_v52 = vmul.f32 1.442695, %v374_v46  ;;  %v353_v53 = vrot.slane %v352_v47, 1  ;;  %v358_v54 = vadd.f32 %v357_v48, %v356_v40 }
 0x1e4   :  { %548 = vpow2.f32 %v387_v49  ;;  %v366_v55 = vadd.f32 %v365_v50, %v364_v43  ;;  %v371_v56 = vrot.slane %v370_v51, 1 }
 0x1e5   :  { %550 = vpow2.f32 %v383_v52  ;;  %v354_v57 = vadd.f32 %v353_v53, %v352_v47  ;;  %v359_v58 = vrot.slane %v358_v54, 1 }
 0x1e6   :  { %v379_v59 = vsub.f32 0.0, %v366_v55  ;;  %v372_v60 = vadd.f32 %v371_v56, %v370_v51 }
 0x1e7   :  { %v377_v61 = vsub.f32 0.0, %v354_v57  ;;  %v360_v62 = vadd.f32 %v359_v58, %v358_v54 }
 0x1e8   :  { %v393_v63 = vmul.f32 1.442695, %v379_v59  ;;  %v380_v0 = vsub.f32 0.0, %v372_v60 }
 0x1e9   :  { %v389_v1 = vmul.f32 1.442695, %v377_v61  ;;  %v378_v2 = vsub.f32 0.0, %v360_v62 }
 0x1ea   :  { %552 = vpow2.f32 %v393_v63  ;;  %v395_v3 = vmul.f32 1.442695, %v380_v0 }
 0x1eb   :  { %554 = vpow2.f32 %v389_v1  ;;  %v391_v4 = vmul.f32 1.442695, %v378_v2 }
 0x1ec   :  { %v545_v5 = vpop.eup %544  ;;  %556 = vpow2.f32 %v395_v3 }
 0x1ed   :  { %v547_v6 = vpop.eup %546  ;;  %558 = vpow2.f32 %v391_v4  ;;  %v399_v10 = vadd.f32 1.0, %v545_v5 }
 0x1ee   :  { %v549_v7 = vpop.eup %548  ;;  %v397_v8 = vadd.f32 1.0, %v547_v6 }
 0x1ef   :  { %v551_v9 = vpop.eup %550  ;;  %v400_v11 = vadd.f32 1.0, %v549_v7 }
 0x1f0   :  { %v398_v12 = vadd.f32 1.0, %v551_v9  ;;  %560 = vrcp.f32 %v397_v8 }
 0x1f2   :  { %562 = vrcp.f32 %v398_v12 }
 0x1f3   :  { %564 = vrcp.f32 %v399_v10 }
 0x1f4   :  { %v553_v13 = vpop.eup %552  ;;  %566 = vrcp.f32 %v400_v11 }
 0x1f5   :  { %v555_v14 = vpop.eup %554  ;;  %v403_v18 = vadd.f32 1.0, %v553_v13 }
 0x1f6   :  { %v557_v15 = vpop.eup %556  ;;  %v401_v16 = vadd.f32 1.0, %v555_v14 }
 0x1f7   :  { %v559_v17 = vpop.eup %558  ;;  %v404_v19 = vadd.f32 1.0, %v557_v15 }
 0x1f8   :  { %568 = vrcp.f32 %v401_v16  ;;  %v402_v20 = vadd.f32 1.0, %v559_v17 }
 0x1fa   :  { %570 = vrcp.f32 %v402_v20  ;;  %v561_v21 = vpop.eup %560 }
 0x1fb   :  { %572 = vrcp.f32 %v403_v18 }
 0x1fc   :  { %v563_v22 = vpop.eup %562  ;;  %574 = vrcp.f32 %v404_v19 }
 0x1fd   :  { %v565_v23 = vpop.eup %564  ;;  %v422_v24 = vsel %vm421_vm1, %v563_v22, %v561_v21 }
 0x1fe   :  { %v567_v25 = vpop.eup %566  ;;  %v424_v26 = vsel %vm423_vm2, %v565_v23, %v422_v24 }
 0x1ff   :  { %v426_v27 = vsel %vm425_vm3, %v567_v25, %v424_v26 }
 0x202   :  { %v569_v28 = vpop.eup %568 }
 0x203   :  { %v428_v29 = vsel %vm427_vm4, %v569_v28, %v426_v27 }
 0x204   :  { %v571_v30 = vpop.eup %570 }
 0x205   :  { %v573_v31 = vpop.eup %572  ;;  %v430_v32 = vsel %vm429_vm5, %v571_v30, %v428_v29 }
 0x206   :  { %v575_v33 = vpop.eup %574  ;;  %v432_v34 = vsel %vm431_vm6, %v573_v31, %v430_v32 }
 0x207   :  { %v434_v35 = vsel %vm433_vm7, %v575_v33, %v432_v34 }
 0x208   :  { %436 = vst [vmem:[#allocation5] sm:$0xff] %v434_v35 }
 0x209   :  { %609 = shalt.err (!%p606_p12)
}
 0x20a   :  { %s610_s28 = scalar_lea.hbm %s724_s6, 128 }
 0x20b   :  { %p611_p13 = scmp.ne.s32.totalorder %s724_s6, %s610_s28  ;;  %p614_p0 = scmp.lt.u32.totalorder %s610_s28, %s724_s6 }
 0x20d   :  { %p616_p1 = pnand %p614_p0, %p611_p13 }
 0x20f   :  { %619 = shalt.err (!%p616_p1)
}
 0x210   :  { %446 = dma.vmem_to_hbm [thread:$0]  %s444_s5, 128, %s724_s6, [#allocation4]  }
 0x211   :  { %622 = dma.done.wait [#allocation4], 128  }
 0x212   :  { %623 = vsyncadd [#allocation4], 4294967168 }
 0x213   :  { %450 = vsyncpa [#allocation3], 1 }
 0x214   :  { %451 = vsyncpa [#allocation4], 1 }

</bundles_post_ra>
